<compile_context>
chip_gen: v6e
topology: v6e:2x2x1
jax: 0.10.0
libtpu: 0.0.40
codegen_flags: <defaults>
</compile_context>

<pallas_src>
import functools

import jax
import jax.numpy as jnp
import numpy as np
from jax.experimental import pallas as pl
from jax.experimental.pallas import tpu as pltpu


def _gcn_kernel(node_ref, adj_ref, w_ref, b_ref, out_ref, *,
                mxu_dtype, swap_order, approx_recip):
    # node_ref: (Bt, N, F_in), adj_ref: (Bt, N, N) [bf16 or f32],
    # w_ref: (F_in, F_out), b_ref: (1, F_out), out_ref: (Bt, N, F_out)
    bt, n, f_in = node_ref.shape
    f_out = out_ref.shape[-1]

    adj = adj_ref[...]
    node = node_ref[...]

    # Degree (f32 accumulation) and its reciprocal.  The scale is applied after the
    # adjacency matmul (linear), so a normalized (N, N) adjacency is never built.
    deg = jnp.sum(adj, axis=-1, keepdims=True, dtype=jnp.float32)     # (Bt, N, 1)
    inv_deg = pl.reciprocal(deg, approx=approx_recip)

    w = w_ref[...].astype(mxu_dtype)
    bias = b_ref[...].astype(jnp.float32)
    adj_m = adj.astype(mxu_dtype)   # no-op on the bf16 fast path

    if swap_order:
        # F_out <= F_in: dense linear first, so the N^2 matmul contracts the
        # narrower F_out instead of F_in.
        h = jnp.dot(node.reshape(bt * n, f_in).astype(mxu_dtype), w,
                    preferred_element_type=jnp.float32)               # (Bt*N, F_out)
        h = h.reshape(bt, n, f_out).astype(mxu_dtype)
        agg = jnp.einsum("bij,bjf->bif", adj_m, h,
                         preferred_element_type=jnp.float32)          # (Bt, N, F_out)
        lin = agg * inv_deg + bias
    else:
        # F_in < F_out: aggregate first (N^2 * F_in MACs), then one big dense
        # (Bt*N, F_in) @ (F_in, F_out) MXU matmul.
        agg = jnp.einsum("bij,bjf->bif", adj_m, node.astype(mxu_dtype),
                         preferred_element_type=jnp.float32)          # (Bt, N, F_in)
        agg = (agg * inv_deg).astype(mxu_dtype)
        lin = jnp.dot(agg.reshape(bt * n, f_in), w,
                      preferred_element_type=jnp.float32)
        lin = lin.reshape(bt, n, f_out) + bias

    # LeakyReLU epilogue kept in f32 (v5e has no bf16 VPU).
    out = jnp.where(lin > 0, lin, 0.01 * lin)
    out_ref[...] = out.astype(out_ref.dtype)


def _tpu_memory_params():
    """Returns (vmem_limit_bytes, block_budget_bytes, assume_two_tensorcores)."""
    try:
        vmem_cap = int(pltpu.get_tpu_info().vmem_capacity_bytes)
    except Exception:
        vmem_cap = 64 * 1024 * 1024          # conservative fallback, safe everywhere
    if vmem_cap <= 96 * 1024 * 1024:         # v7x-like: 64 MiB per TC, 2 TCs per chip
        return 48 * 1024 * 1024, 44 * 1024 * 1024, True
    # v5e / v6e: 128 MiB VMEM, single TensorCore -- use big blocks, few grid steps.
    return 100 * 1024 * 1024, 96 * 1024 * 1024, False


def _choose_bt(B, N, F_in, F_out, adj_bytes, mxu_bytes, budget_bytes, two_cores):
    """Largest divisor of B whose blocks + in-kernel temporaries fit the VMEM budget.
    On 2-TC chips prefer an EVEN number of grid steps so both TensorCores stay busy."""
    adj_cast_tmp = 0 if mxu_bytes == adj_bytes else N * N * mxu_bytes
    per_graph = (
        2 * N * N * adj_bytes              # adjacency block (double-buffered input)
        + 2 * N * F_in * 4                 # node block (double-buffered input, f32)
        + 2 * N * F_out * 4                # output block (double-buffered output, f32)
        + adj_cast_tmp                     # in-kernel adjacency upcast (exact path)
        + N * max(F_in, F_out) * 4         # f32 matmul accumulator
        + N * (F_in + F_out) * mxu_bytes   # mxu-dtype casts of node / intermediate
        + 2 * N * 4                        # degree + reciprocal
    )
    fixed = (F_in * F_out + F_out) * (2 * 4 + mxu_bytes)   # double-buffered w/bias + cast
    cap = max(1, (budget_bytes - fixed) // per_graph)

    divisors = [d for d in range(1, B + 1) if B % d == 0 and d <= cap]
    if not divisors:
        divisors = [1]
    if two_cores and B >= 2:
        even = [d for d in divisors if (B // d) % 2 == 0]
        if even:
            return max(even)
        multi = [d for d in divisors if (B // d) >= 2]
        if multi:
            return max(multi)
    return max(divisors)


def convolution_layer(node_mat, adj_mat, weight, bias, *,
                      mxu_dtype=None, adj_bf16=True):
    """node_mat: (B, N, F_in), adj_mat: (B, N, N),
       weight: (F_out, F_in)  (PyTorch nn.Linear layout), bias: (F_out,).

       mxu_dtype=None      -> matmuls in the node dtype (exact);
       mxu_dtype=bfloat16  -> bf16 MXU inputs with f32 accumulation (fast).
       adj_bf16=True ships the adjacency to the kernel as bf16 (exact for 0/1
       adjacencies, the chem-GCN case); pass False for weighted adjacencies."""
    B, N, F_in = node_mat.shape
    F_out = weight.shape[0]

    mxu_dtype = np.dtype(node_mat.dtype) if mxu_dtype is None else np.dtype(mxu_dtype)
    approx_recip = mxu_dtype != np.dtype(np.float32)     # EUP recip only on fast path
    swap_order = F_out <= F_in

    # Sublane-align N; padded rows get a self-loop so their degree > 0 (no inf/NaN)
    # and are sliced off again after the kernel.
    N_pad = ((N + 7) // 8) * 8
    if N_pad != N:
        node_mat = jnp.pad(node_mat, ((0, 0), (0, N_pad - N), (0, 0)))
        adj_mat = jnp.pad(adj_mat, ((0, 0), (0, N_pad - N), (0, N_pad - N)))
        pad_idx = jnp.arange(N, N_pad)
        pad_eye = jnp.zeros((N_pad, N_pad), adj_mat.dtype).at[pad_idx, pad_idx].set(1)
        adj_mat = adj_mat + pad_eye[None]

    # Adjacency at rest in bf16: halves the dominant O(B*N^2) HBM read.
    adj_in = adj_mat.astype(jnp.bfloat16) if adj_bf16 else adj_mat
    adj_bytes = int(np.dtype(adj_in.dtype).itemsize)

    # True-width weight / bias / output (no 128-lane padding, no trailing slice).
    w_t = weight.T                      # (F_in, F_out)
    b2d = bias.reshape(1, F_out)

    vmem_limit, budget, two_cores = _tpu_memory_params()
    bt = _choose_bt(B, N_pad, F_in, F_out, adj_bytes, int(mxu_dtype.itemsize),
                    budget, two_cores)

    kernel = functools.partial(_gcn_kernel, mxu_dtype=mxu_dtype,
                               swap_order=swap_order, approx_recip=approx_recip)

    grid_spec = pltpu.PrefetchScalarGridSpec(
        num_scalar_prefetch=0,
        grid=(B // bt,),
        in_specs=[
            pl.BlockSpec((bt, N_pad, F_in), lambda b: (b, 0, 0)),     # node features
            pl.BlockSpec((bt, N_pad, N_pad), lambda b: (b, 0, 0)),    # adjacency (bf16)
            # TODO(synk): pipeline_mode=pl.Buffered(1) on the two grid-constant blocks
            # below to recover one weight block of VMEM at very large F_in * F_out.
            pl.BlockSpec((F_in, F_out), lambda b: (0, 0)),            # weight (shared)
            pl.BlockSpec((1, F_out), lambda b: (0, 0)),               # bias (shared)
        ],
        out_specs=pl.BlockSpec((bt, N_pad, F_out), lambda b: (b, 0, 0)),
    )

    out_bytes = int(np.dtype(node_mat.dtype).itemsize)
    cost = pl.CostEstimate(
        flops=2 * B * N_pad * N_pad * min(F_in, F_out) + 2 * B * N_pad * F_in * F_out,
        transcendentals=0,
        bytes_accessed=(int(adj_in.size) * adj_bytes
                        + int(node_mat.size) * int(node_mat.dtype.itemsize)
                        + int(w_t.size) * int(w_t.dtype.itemsize)
                        + int(b2d.size) * int(b2d.dtype.itemsize)
                        + B * N_pad * F_out * out_bytes),
    )

    out = pl.pallas_call(
        kernel,
        out_shape=jax.ShapeDtypeStruct((B, N_pad, F_out), node_mat.dtype),
        grid_spec=grid_spec,
        compiler_params=pltpu.CompilerParams(
            dimension_semantics=("parallel",),    # batch-block axis -> 2 TCs on v7x
            vmem_limit_bytes=vmem_limit,
        ),
        cost_estimate=cost,
    )(node_mat, adj_in, w_t, b2d)

    return out if N_pad == N else out[:, :N, :]


def _reference(node_mat, adj_mat, weight, bias):
    deg = adj_mat.sum(axis=-1, keepdims=True)
    norm_adj = adj_mat / deg
    agg = jnp.einsum("bij,bjf->bif", norm_adj, node_mat)
    lin = jnp.einsum("bif,of->bio", agg, weight) + bias
    return jnp.where(lin > 0, lin, 0.01 * lin)


def _make_inputs(key, B, N, f_in, f_out):
    k1, k2, k3, k4 = jax.random.split(key, 4)
    node_mat = jax.random.normal(k1, (B, N, f_in), dtype=jnp.float32)
    # random binary adjacency with self-loops so every row degree > 0
    adj_bits = (jax.random.uniform(k2, (B, N, N)) > 0.5).astype(jnp.float32)
    adj_mat = jnp.maximum(adj_bits, jnp.eye(N, dtype=jnp.float32)[None])
    bound = 1.0 / (f_in ** 0.5)
    weight = jax.random.uniform(k3, (f_out, f_in), minval=-bound, maxval=bound,
                                dtype=jnp.float32)
    bias = jax.random.uniform(k4, (f_out,), minval=-bound, maxval=bound,
                              dtype=jnp.float32)
    return node_mat, adj_mat, weight, bias


if __name__ == "__main__":
    key = jax.random.PRNGKey(0)
    k_a, k_b = jax.random.split(key, 2)

    # Test 1: demo shape (exercises the swap_order=True / "linear first" path).
    B, N, node_in_len, node_out_len = 8, 16, 32, 32
    node_mat, adj_mat, weight, bias = _make_inputs(k_a, B, N, node_in_len, node_out_len)
    ref = _reference(node_mat, adj_mat, weight, bias)

    out = jax.block_until_ready(convolution_layer(node_mat, adj_mat, weight, bias))
    assert out.shape == (B, N, node_out_len)
    assert jnp.allclose(out, ref, atol=1e-5, rtol=1e-5)

    # Fast path: bf16 MXU inputs, f32 accumulation, EUP reciprocal.
    out_fast = jax.block_until_ready(
        convolution_layer(node_mat, adj_mat, weight, bias, mxu_dtype=jnp.bfloat16))
    assert out_fast.shape == (B, N, node_out_len)
    assert jnp.allclose(out_fast, ref, atol=3e-2, rtol=3e-2)

    # Test 2: non-sublane-aligned N and F_in < F_out (exercises N-padding and the
    # swap_order=False / "aggregate first" path).
    B2, N2, f_in2, f_out2 = 4, 13, 8, 24
    node2, adj2, w2, b2 = _make_inputs(k_b, B2, N2, f_in2, f_out2)
    ref2 = _reference(node2, adj2, w2, b2)
    out2 = jax.block_until_ready(convolution_layer(node2, adj2, w2, b2))
    assert out2.shape == (B2, N2, f_out2)
    assert jnp.allclose(out2, ref2, atol=1e-5, rtol=1e-5)

    print("KERNEL_OK")
</pallas_src>

<mosaic_0001>
module attributes {stable_mosaic.version = 11 : i64} {
  func.func @_gcn_kernel(%arg0: i32, %arg1: memref<4x16x32xf32, #tpu.memory_space<vmem>>, %arg2: memref<4x16x16xbf16, #tpu.memory_space<vmem>>, %arg3: memref<32x32xf32, #tpu.memory_space<vmem>>, %arg4: memref<1x32xf32, #tpu.memory_space<vmem>>, %arg5: memref<4x16x32xf32, #tpu.memory_space<vmem>>) attributes {dimension_semantics = [#tpu.dimension_semantics<parallel>], iteration_bounds = array<i64: 2>, scalar_prefetch = 0 : i64, scratch_operands = 0 : i64, tpu.core_type = #tpu.core_type<tc>, window_params = [{transform_indices = @transform_0, window_bounds = array<i64: 4, 16, 32>}, {transform_indices = @transform_1, window_bounds = array<i64: 4, 16, 16>}, {pipeline_mode = #tpu.pipeline_mode<synchronous>, transform_indices = @transform_2, window_bounds = array<i64: 32, 32>}, {pipeline_mode = #tpu.pipeline_mode<synchronous>, transform_indices = @transform_3, window_bounds = array<i64: 1, 32>}, {transform_indices = @transform_4, window_bounds = array<i64: 4, 16, 32>}]} {
    %c0 = arith.constant 0 : index
    %c0_0 = arith.constant 0 : index
    %c0_1 = arith.constant 0 : index
    %0 = vector.load %arg2[%c0, %c0_0, %c0_1] : memref<4x16x16xbf16, #tpu.memory_space<vmem>>, vector<4x16x16xbf16>
    %c0_2 = arith.constant 0 : index
    %c0_3 = arith.constant 0 : index
    %c0_4 = arith.constant 0 : index
    %1 = vector.load %arg1[%c0_2, %c0_3, %c0_4] : memref<4x16x32xf32, #tpu.memory_space<vmem>>, vector<4x16x32xf32>
    %2 = arith.extf %0 : vector<4x16x16xbf16> to vector<4x16x16xf32>
    %cst = arith.constant dense<0.000000e+00> : vector<4x16xf32>
    %3 = vector.multi_reduction <add>, %2, %cst [2] : vector<4x16x16xf32> to vector<4x16xf32>
    %4 = vector.shape_cast %3 : vector<4x16xf32> to vector<4x16x1xf32>
    %5 = tpu.reciprocal %4 : vector<4x16x1xf32> -> vector<4x16x1xf32>
    %c0_5 = arith.constant 0 : index
    %c0_6 = arith.constant 0 : index
    %6 = vector.load %arg3[%c0_5, %c0_6] : memref<32x32xf32, #tpu.memory_space<vmem>>, vector<32x32xf32>
    %c0_7 = arith.constant 0 : index
    %c0_8 = arith.constant 0 : index
    %7 = vector.load %arg4[%c0_7, %c0_8] : memref<1x32xf32, #tpu.memory_space<vmem>>, vector<1x32xf32>
    %8 = arith.extf %0 : vector<4x16x16xbf16> to vector<4x16x16xf32>
    %9 = vector.shape_cast %1 : vector<4x16x32xf32> to vector<64x32xf32>
    %cst_9 = arith.constant dense<0.000000e+00> : vector<64x32xf32>
    %10 = tpu.matmul %9, %6, %cst_9 {dimension_numbers = #tpu.dot_dimension_numbers<[1], [0], [0], [1], [0, 0, 1, 1], [], []>} : vector<64x32xf32>, vector<32x32xf32>, vector<64x32xf32> -> vector<64x32xf32>
    %11 = vector.shape_cast %10 : vector<64x32xf32> to vector<4x16x32xf32>
    "tpu.trace_start"() <{level = 10 : i32, message = "bij,bjf->bif"}> : () -> ()
    %cst_10 = arith.constant dense<0.000000e+00> : vector<4x16x32xf32>
    %12 = tpu.matmul %8, %11, %cst_10 {dimension_numbers = #tpu.dot_dimension_numbers<[2], [1], [1], [2], [0, 0, 0, 1, 1, 2], [0], [0]>} : vector<4x16x16xf32>, vector<4x16x32xf32>, vector<4x16x32xf32> -> vector<4x16x32xf32>
    "tpu.trace_stop"() : () -> ()
    %13 = vector.broadcast %5 : vector<4x16x1xf32> to vector<4x16x32xf32>
    %14 = arith.mulf %12, %13 : vector<4x16x32xf32>
    %15 = vector.shape_cast %7 : vector<1x32xf32> to vector<1x1x32xf32>
    %16 = vector.broadcast %15 : vector<1x1x32xf32> to vector<4x16x32xf32>
    %17 = arith.addf %14, %16 : vector<4x16x32xf32>
    %cst_11 = arith.constant 0.000000e+00 : f32
    %18 = vector.broadcast %cst_11 : f32 to vector<4x16x32xf32>
    %19 = arith.cmpf ogt, %17, %18 : vector<4x16x32xf32>
    %cst_12 = arith.constant 0.00999999977 : f32
    %20 = vector.broadcast %cst_12 : f32 to vector<4x16x32xf32>
    %21 = arith.mulf %20, %17 : vector<4x16x32xf32>
    %22 = arith.select %19, %17, %21 : vector<4x16x32xi1>, vector<4x16x32xf32>
    %c0_13 = arith.constant 0 : index
    %c0_14 = arith.constant 0 : index
    %c0_15 = arith.constant 0 : index
    %23 = vector.load %arg5[%c0_13, %c0_14, %c0_15] : memref<4x16x32xf32, #tpu.memory_space<vmem>>, vector<4x16x32xf32>
    tpu.vector_store %arg5[%c0_13, %c0_14, %c0_15], %22 {strides = array<i32>} : memref<4x16x32xf32, #tpu.memory_space<vmem>>, vector<4x16x32xf32>,
    return
  }
  func.func @transform_0(%arg0: i32) -> (i32, i32, i32) {
    %c0_i32 = arith.constant 0 : i32
    %c0_i32_0 = arith.constant 0 : i32
    %c0_i32_1 = arith.constant 0 : i32
    return %arg0, %c0_i32, %c0_i32_0 : i32, i32, i32
  }
  func.func @transform_1(%arg0: i32) -> (i32, i32, i32) {
    %c0_i32 = arith.constant 0 : i32
    %c0_i32_0 = arith.constant 0 : i32
    %c0_i32_1 = arith.constant 0 : i32
    return %arg0, %c0_i32, %c0_i32_0 : i32, i32, i32
  }
  func.func @transform_2(%arg0: i32) -> (i32, i32) {
    %c0_i32 = arith.constant 0 : i32
    %c0_i32_0 = arith.constant 0 : i32
    %c0_i32_1 = arith.constant 0 : i32
    return %c0_i32, %c0_i32_0 : i32, i32
  }
  func.func @transform_3(%arg0: i32) -> (i32, i32) {
    %c0_i32 = arith.constant 0 : i32
    %c0_i32_0 = arith.constant 0 : i32
    %c0_i32_1 = arith.constant 0 : i32
    return %c0_i32, %c0_i32_0 : i32, i32
  }
  func.func @transform_4(%arg0: i32) -> (i32, i32, i32) {
    %c0_i32 = arith.constant 0 : i32
    %c0_i32_0 = arith.constant 0 : i32
    %c0_i32_1 = arith.constant 0 : i32
    return %arg0, %c0_i32, %c0_i32_0 : i32, i32, i32
  }
}

</mosaic_0001>

<bundles_post_ra>
// kernel: tpu_custom_call.1
= control target key start
LH: loop header
LB: loop body
LE: loop exit
PB: predicated region body
PF: predicated region fallthrough
CT: control target
= control target key end

     0   :  { %s1682_s0 = inlined_call_operand.hbm [shape: f32[8,16,32], index: 0, kind: input, shape index: {}]   ;;  %s1683_s1 = inlined_call_operand.hbm [shape: bf16[8,16,16], index: 1, kind: input, shape index: {}]   ;;  %s1684_s2 = inlined_call_operand.hbm [shape: f32[32,32], index: 2, kind: input, shape index: {}]   ;;  %s1685_s3 = inlined_call_operand.vmem [shape: f32[1,32], index: 3, kind: input, shape index: {}]   ;;  %s1686_s4 = inlined_call_operand.hbm [shape: f32[8,16,32], index: 4, kind: output, shape index: {}]  }
   0x1   :  { %1690 = sst [smem:[#allocation13_spill]] %s1682_s0 }
   0x2   :  { %1691 = sst [smem:[#allocation14_spill]] %s1684_s2 }
   0x3   :  { %9 = vsyncpa [#allocation3], 0 }
   0x4   :  { %11 = vsyncpa [#allocation3 + $0x1], 0 }
   0x5   :  { %12 = vsyncpa [#allocation6], 0 }
   0x6   :  { %14 = vsyncpa [#allocation6 + $0x1], 0 }
   0x7   :  { %15 = vsyncpa [#allocation4], 0 }
   0x8   :  { %17 = vsyncpa [#allocation4 + $0x1], 0  ;;  %s1381_s15 = smov 0   ;;  %s1383_s16 = smov 0  }
   0x9   :  { %s1385_s17 = smov 0   ;;  %s1387_s18 = smov 0  }
   0xa LB: > { %s1402_s19 = sadd.s32 4294967295, %s1344_s18   ;;  %s965_s20 = sadd.s32 4294967294, %s1344_s18   ;;  %s1344_s18 = sphi %s1387_s18, %s1711_s18   ;;  %s1340_s17 = sphi %s1385_s17, %s1710_s17   ;;  %s1336_s16 = sphi %s1383_s16, %s1709_s16   ;;  %s1332_s15 = sphi %s1381_s15, %s1708_s15  }
   0xb   : > { %p43_p0 = scmp.ne.s32.totalorder %s1336_s16, %s1332_s15  ;;  %p1687_p1 = scmp.eq.s32.totalorder %s1402_s19, 0 }
   0xc   : > { %p141_p3 = scmp.eq.s32.totalorder %s965_s20, 1  ;;  %p966_p5 = scmp.ge.s32.totalorder %s1344_s18, 1 }
   0xd   : > { %p1411_p4 = por %p1687_p1, %p43_p0  ;;  %p148_p7 = scmp.lt.s32.totalorder %s1344_s18, 3 }
   0xe   : > { %p1416_p6 = por %p141_p3, %p43_p0  ;;  %s1346_s24 = smov [#allocation7]  }
   0xf   : > { %s1692_s21 = scalar_select %p1411_p4, 1, 0 }
  0x10   : > { %s1693_s22 = scalar_select %p1416_p6, 1, 0 }
  0x11   : > { %p1421_p8 = pnand %p966_p5, %p148_p7  ;;  %s160_s25 = sshll.u32 %s1346_s24, 4  ;;  %s161_s25 = int_to_ptr.vmem [resolvable:$true] %s160_s25 }
  0x12   : > { %s1435_s27 = sadd.s32 1, %s1344_s18   ;;  %s30_s28 = sadd.s32 1, %s1340_s17 }
  0x13   : > { %p1116_p9 = pneg %p1421_p8  ;;  %s27_s29 = ssub.s32 %s1344_s18, %s1435_s27 }
  0x14   : > { %s1201_s30 = scalar_lea.vmem %s161_s25, 512  ;;  %p1209_p5 = scmp.lt.s32.totalorder %s161_s25, %s161_s25 }
  0x15   : > { %p1430_p11 = pnand %p1116_p9, %p1687_p1  ;;  %p1202_p13 = scmp.ne.s32.totalorder %s161_s25, %s1201_s30 }
  0x16   : > { %p1210_p7 = scmp.lt.s32.totalorder %s1201_s30, %s1201_s30 }
  0x17   : > { %p1192_p12 = pneg %p1430_p11 }
  0x18   : > { %p1211_p10 = por %p1210_p7, %p1209_p5 }
  0x19   : > { %p1204_p0 = pnand %p1202_p13, %p1192_p12 }
  0x1b   : > { %p1205_p3 = pneg %p1204_p0 }
  0x1d   : > { %p1212_p2 = pnand %p1211_p10, %p1205_p3 }
  0x1f   : > { %1215 = shalt.err (!%p1212_p2)
}
  0x20   : > { %s1347_s5 = smov 128   ;;  %s1348_s6 = smov 8  }
  0x21   : > { %s1696_s2 = sld [smem:[#allocation14_spill]]  ;;  %p28_p2 = scmp.eq.s32.totalorder %s27_s29, 0 }
  0x22   : > { %p37_p9 = scmp.ne.s32.totalorder %s1340_s17, %s1336_s16  ;;  %p38_p10 = scmp.eq.s32.totalorder %s1344_s18, 0 }
  0x23   : > { %p1132_p12 = scmp.lt.s32.totalorder %s1344_s18, 2  ;;  %p1697_p0 = scmp.eq.s32.totalorder %s1402_s19, 1 }
  0x24   : > { %s1455_s9 = scalar_select %p28_p2, %s1340_s17, %s30_s28  }
  0x25   : > { %p39_p13 = por %p38_p10, %p37_p9  ;;  %p1459_p3 = por %p1697_p0, %p37_p9 }
  0x26   : > { %s1464_s11 = sand.u32 1, %s1340_s17   ;;  %s1006_s12 = sshll.u32 %s1344_s18, 10 }
  0x27   : > { %1119 = dma.hbm_to_vmem [thread:$0]  (!%p1430_p11), %s1696_s2, 512, %s161_s25, [#allocation6], %s1347_s5, %s1347_s5, %s1348_s6  }
  0x28   : > { %s1698_s10 = scalar_select %p1459_p3, 1, 0 }
  0x29   : > { %s969_s13 = sshll.u32 %s1464_s11, 6  ;;  %s1699_s0 = sld [smem:[#allocation13_spill]] }
  0x2a   : > { %s181_s25 = scalar_lea.vmem [#allocation2], %s969_s13  ;;  %p1473_p11 = pnand %p1132_p12, %p39_p13 }
  0x2b   : > { %s189_s26 = sshll.u32 %s181_s25, 4  ;;  %s178_s30 = scalar_lea.sflag [#allocation3], %s1464_s11  ;;  %s1477_s26 = int_to_ptr.vmem [resolvable:$true] %s189_s26 }
  0x2c   : > { %p1218_p7 = pneg %p1473_p11 }
  0x2f   : > { %s1471_s24 = scalar_lea.hbm %s1699_s0, %s1006_s12  ;;  %s1221_s13 = scalar_lea.hbm %s1699_s0, 2048 }
  0x30   : > { %s1216_s7 = scalar_lea.hbm %s1471_s24, 1024  ;;  %p1222_p10 = scmp.lt.s32.totalorder %s1471_s24, %s1699_s0 }
  0x31   : > { %p1217_p5 = scmp.ne.s32.totalorder %s1471_s24, %s1216_s7  ;;  %p1223_p12 = scmp.lt.s32.totalorder %s1221_s13, %s1216_s7 }
  0x33   : > { %p1219_p2 = pnand %p1218_p7, %p1217_p5  ;;  %p1224_p13 = por %p1223_p12, %p1222_p10 }
  0x35   : > { %p1220_p9 = pneg %p1219_p2 }
  0x37   : > { %p1225_p0 = pnand %p1224_p13, %p1220_p9 }
  0x39   : > { %1228 = shalt.err (!%p1225_p0)
}
  0x3a   : > { %s1229_s25 = scalar_lea.vmem %s1477_s26, 1024  ;;  %s1349_s8 = smov [#allocation2]  }
  0x3b   : > { %p1230_p1 = scmp.ne.s32.totalorder %s1477_s26, %s1229_s25  ;;  %s1234_s12 = sshll.u32 %s1349_s8, 4  ;;  %s1235_s12 = int_to_ptr.vmem [resolvable:$false] %s1234_s12 }
  0x3c   : > { %s1236_s29 = scalar_lea.vmem %s1235_s12, 2048  ;;  %p1237_p6 = scmp.lt.s32.totalorder %s1477_s26, %s1235_s12 }
  0x3d   : > { %p1232_p5 = pnand %p1230_p1, %p1218_p7  ;;  %p1238_p3 = scmp.lt.s32.totalorder %s1236_s29, %s1229_s25 }
  0x3f   : > { %p1233_p2 = pneg %p1232_p5  ;;  %p1239_p4 = por %p1238_p3, %p1237_p6 }
  0x41   : > { %p1240_p10 = pnand %p1239_p4, %p1233_p2 }
  0x43   : > { %1243 = shalt.err (!%p1240_p10)
}
  0x44   : > { %1123 = dma.hbm_to_vmem [thread:$0]  (!%p1473_p11), %s1471_s24, 1024, %s1477_s26, %s178_s30, %s1347_s5, %s1347_s5, %s1348_s6  }
  0x45   : > { %s973_s7 = sshll.u32 %s1464_s11, 5  ;;  %s1008_s13 = sshll.u32 %s1344_s18, 9 }
  0x46   : > { %s1515_s20 = scalar_lea.hbm %s1683_s1, %s1008_s13  ;;  %s203_s25 = scalar_lea.vmem [#allocation5], %s973_s7 }
  0x47   : > { %s211_s8 = sshll.u32 %s203_s25, 4  ;;  %s1701_s12 = sand.u32 1, %s1344_s18   ;;  %s1517_s8 = int_to_ptr.vmem [resolvable:$true] %s211_s8 }
  0x48   : > { %s1521_s0 = scalar_lea.sflag [#allocation6], %s1701_s12  ;;  %s1244_s2 = scalar_lea.hbm %s1515_s20, 512 }
  0x49   : > { %p1245_p1 = scmp.ne.s32.totalorder %s1515_s20, %s1244_s2  ;;  %s1249_s11 = scalar_lea.hbm %s1683_s1, 1024 }
  0x4a   : > { %p1250_p3 = scmp.lt.s32.totalorder %s1515_s20, %s1683_s1  ;;  %p1251_p9 = scmp.lt.s32.totalorder %s1249_s11, %s1244_s2 }
  0x4b   : > { %p1247_p4 = pnand %p1245_p1, %p1218_p7 }
  0x4c   : > { %p1252_p12 = por %p1251_p9, %p1250_p3 }
  0x4d   : > { %p1248_p6 = pneg %p1247_p4 }
  0x4f   : > { %p1253_p13 = pnand %p1252_p12, %p1248_p6 }
  0x51   : > { %1256 = shalt.err (!%p1253_p13)
}
  0x52   : > { %s1257_s30 = scalar_lea.vmem %s1517_s8, 512  ;;  %s1350_s7 = smov [#allocation5]  }
  0x53   : > { %p1258_p0 = scmp.ne.s32.totalorder %s1517_s8, %s1257_s30  ;;  %s1262_s13 = sshll.u32 %s1350_s7, 4  ;;  %s1263_s13 = int_to_ptr.vmem [resolvable:$false] %s1262_s13 }
  0x54   : > { %s1264_s29 = scalar_lea.vmem %s1263_s13, 1024  ;;  %p1265_p10 = scmp.lt.s32.totalorder %s1517_s8, %s1263_s13 }
  0x55   : > { %p1260_p5 = pnand %p1258_p0, %p1218_p7  ;;  %p1266_p1 = scmp.lt.s32.totalorder %s1264_s29, %s1257_s30 }
  0x57   : > { %p1261_p2 = pneg %p1260_p5  ;;  %p1267_p4 = por %p1266_p1, %p1265_p10 }
  0x59   : > { %p1268_p3 = pnand %p1267_p4, %p1261_p2 }
  0x5b   : > { %1271 = shalt.err (!%p1268_p3)
}
  0x5c   : > { %s1351_s2 = smov 64   ;;  %s1352_s14 = smov 4  }
  0x5d   : > { %1126 = dma.hbm_to_vmem [thread:$0]  (!%p1473_p11), %s1515_s20, 512, %s1517_s8, %s1521_s0, %s1351_s2, %s1351_s2, %s1352_s14  }
  0x5e   : > { %223 = sbr.rel (%p1421_p8) target bundleno = 541 (0x21d), region = 36  ;;  %s1549_s25 = sand.u32 (!%p1421_p8), 1, %s1336_s16  }
  0x5f   : > { %s978_s12 = sshll.u32 (!%p1421_p8), %s1549_s25, 6  ;;  %s226_s5 = scalar_lea.sflag (!%p1421_p8), [#allocation3], %s1549_s25 }
  0x60   : > { %s1555_s6 = scalar_lea.vmem (!%p1421_p8), [#allocation2], %s978_s12  ;;  %p1702_p7 = scmp.ne.s32.totalorder (!%p1421_p8), %s1692_s21, 0 }
  0x63   : > { %1315 = dma.done.wait (%p1702_p7), %s226_s5, 1024  }
  0x64   : > { %1317 = vsyncadd (%p1702_p7), %s226_s5, 4294966272  ;;  %s234_s0 = sand.u32 1, %s1402_s19   ;;  %s979_s23 = sshll.u32 %s1549_s25, 5 }
  0x65   : > { %s235_s28 = scalar_lea.sflag [#allocation6], %s234_s0  ;;  %s1563_s20 = scalar_lea.vmem [#allocation5], %s979_s23 }
  0x66   : > { %1319 = dma.done.wait (%p1702_p7), %s235_s28, 512  }
  0x67   : > { %1321 = vsyncadd (%p1702_p7), %s235_s28, 4294966784  ;;  %p1703_p8 = scmp.eq.s32.totalorder %s1402_s19, 0 }
  0x69   : > { %1323 = dma.done.wait (%p1703_p8), [#allocation6], 512   ;;  %p1704_p11 = pmov %p1703_p8 }
  0x6a   : > { %vm337_vm0 = vcmask 261120   ;;  %v335_v0 = vld [vmem:[#allocation7 + $0x18] sm:$0xff]  ;;  %v334_v1 = vld [vmem:[#allocation7 + $0x10] sm:$0xff]  ;;  %v283_v2 = vld [vmem:[%s1555_s6] sm:$0xff]  ;;  %vm299_vm1 = vcmask 130048   ;;  %s1614_s11 = scalar_lea.vmem [#allocation8], %s978_s12 }
  0x6b   : > { %1325 = vsyncadd (%p1704_p11), [#allocation6], 4294966784  ;;  %1058 = vmatprep.subr.mxu0 %v335_v0  ;;  %v333_v3 = vld [vmem:[#allocation7 + $0x8] sm:$0xff]  ;;  %1066 = vmatprep.mubr.msk.f32.mxu0 %vm337_vm0, %v283_v2  ;;  %v332_v4 = vld [vmem:[#allocation7] sm:$0xff]  ;;  %s1010_s24 = sshll.u32 %s1402_s19, 10  ;;  %s860_s26 = sshll.u32 %s1614_s11, 4  ;;  %s1637_s26 = int_to_ptr.vmem [resolvable:$true] %s860_s26 }
  0x6c   : > { %1059 = vmatpush3.msra.mxu0 %v335_v0  ;;  %v284_v5 = vld [vmem:[%s1555_s6 + $0x8] sm:$0xff]  ;;  %v285_v6 = vld [vmem:[%s1555_s6 + $0x10] sm:$0xff]  ;;  %v286_v7 = vld [vmem:[%s1555_s6 + $0x18] sm:$0xff]  ;;  %s1635_s13 = scalar_lea.hbm %s1686_s4, %s1010_s24  ;;  %s846_s19 = scalar_lea.sflag [#allocation4], %s1549_s25 }
  0x6d   : > { %1060 = vmatprep.subr.mxu0 %v334_v1  ;;  %v287_v8 = vld [vmem:[%s1555_s6 + $0x20] sm:$0xff]  ;;  %v288_v9 = vld [vmem:[%s1555_s6 + $0x28] sm:$0xff]  ;;  %v289_v10 = vld [vmem:[%s1555_s6 + $0x30] sm:$0xff]  ;;  %s1272_s29 = scalar_lea.vmem %s1637_s26, 1024  ;;  %p1705_p9 = scmp.ne.s32.totalorder %s1698_s10, 0 }
  0x6e   : > { %1061 = vmatpush3.msra.mxu0 %v334_v1  ;;  %v290_v11 = vld [vmem:[%s1555_s6 + $0x38] sm:$0xff]  ;;  %v1012_v12 = vld [vmem:[%s1563_s20] sm:$0xff]   ;;  %v1027_v14 = vld [vmem:[%s1563_s20 + $0x8] sm:$0xff]   ;;  %p1273_p6 = scmp.ne.s32.totalorder %s1637_s26, %s1272_s29  ;;  %s1353_s2 = smov [#allocation8]  }
  0x6f   : > { %1062 = vmatprep.subr.mxu0 %v333_v3  ;;  %v1013_v13 = vunpack.c.l.bf16 %v1012_v12  ;;  %v1017_v15 = vunpack.c.l.bf16 %v1027_v14  ;;  %v1014_v16 = vunpack.c.h.bf16 %v1012_v12  ;;  %v1018_v17 = vunpack.c.h.bf16 %v1027_v14  ;;  %v1028_v20 = vld [vmem:[%s1563_s20 + $0x10] sm:$0xff]   ;;  %v1029_v25 = vld [vmem:[%s1563_s20 + $0x18] sm:$0xff]   ;;  %v998_v50 = vld [vmem:[%s1685_s3] ss:$0 sm:$0xff]  ;;  %s1276_s14 = sshll.u32 %s1353_s2, 4  ;;  %s1277_s14 = int_to_ptr.vmem [resolvable:$false] %s1276_s14 }
  0x70   : > { %1063 = vmatpush3.msra.mxu0 %v333_v3  ;;  %v1021_v23 = vunpack.c.l.bf16 %v1028_v20  ;;  %v1022_v24 = vunpack.c.h.bf16 %v1028_v20  ;;  %v1025_v28 = vunpack.c.l.bf16 %v1029_v25  ;;  %v1026_v29 = vunpack.c.h.bf16 %v1029_v25  ;;  %p1274_p12 = pnand %p1273_p6, %p1705_p9  ;;  %s1278_s12 = scalar_lea.vmem %s1277_s14, 2048 }
  0x71   : > { %1064 = vmatprep.subr.mxu0 %v332_v4  ;;  %1082 = vmatprep.mubr.msk.f32.mxu1 %vm299_vm1, %v1013_v13  ;;  %v300_v18 = vsel %vm299_vm1, %v1013_v13, 0.0  ;;  %v306_v19 = vsel %vm299_vm1, %v1017_v15, 0.0  ;;  %v303_v21 = vsel %vm299_vm1, %v1014_v16, 0.0  ;;  %v309_v22 = vsel %vm299_vm1, %v1018_v17, 0.0  ;;  %p1279_p0 = scmp.lt.s32.totalorder %s1637_s26, %s1277_s14  ;;  %p1280_p5 = scmp.lt.s32.totalorder %s1278_s12, %s1272_s29 }
  0x72   : > { %1065 = vmatpush3.msra.mxu0 %v332_v4  ;;  %301 = vadd.xlane.f32.xlu0 %v300_v18  ;;  %v315_v26 = vsel %vm299_vm1, %v1022_v24, 0.0  ;;  %v312_v27 = vsel %vm299_vm1, %v1021_v23, 0.0  ;;  %v321_v30 = vsel %vm299_vm1, %v1026_v29, 0.0  ;;  %v318_v31 = vsel %vm299_vm1, %v1025_v28, 0.0  ;;  %p1275_p13 = pneg %p1274_p12 }
  0x73   : > { %1067 = vmatmul.mubr.msk.f32.vlgmr.msra.gmra.mxu0 %vm337_vm0, %v284_v5  ;;  %307 = vadd.xlane.f32.xlu1 %v306_v19  ;;  %p1281_p2 = por %p1280_p5, %p1279_p0 }
  0x74   : > { %1069 = vmatprep.mubr.msk.f32.mxu0 %vm337_vm0, %v285_v6 }
  0x75   : > { %p1282_p10 = pnand %p1281_p2, %p1275_p13 }
  0x76   : > { %304 = vadd.xlane.f32.xlu0 %v303_v21 }
  0x77   : > { %1070 = vmatmul.mubr.msk.f32.gmra.mxu0 %vm337_vm0, %v286_v7  ;;  %310 = vadd.xlane.f32.xlu1 %v309_v22 }
  0x78   : > { %1072 = vmatprep.mubr.msk.f32.mxu0 %vm337_vm0, %v287_v8 }
  0x7a   : > { %313 = vadd.xlane.f32.xlu0 %v312_v27 }
  0x7b   : > { %1073 = vmatmul.mubr.msk.f32.gmra.mxu0 %vm337_vm0, %v288_v9  ;;  %316 = vadd.xlane.f32.xlu1 %v315_v26 }
  0x7c   : > { %1075 = vmatprep.mubr.msk.f32.mxu0 %vm337_vm0, %v289_v10 }
  0x7e   : > { %319 = vadd.xlane.f32.xlu0 %v318_v31 }
  0x7f   : > { %1076 = vmatmul.mubr.msk.f32.gmra.mxu0 %vm337_vm0, %v290_v11  ;;  %322 = vadd.xlane.f32.xlu1 %v321_v30 }
  0xfb   : > { %v302_v40 = vpop.xlane.xlu0 %301 }
  0xfc   : > { %v308_v41 = vpop.xlane.xlu1 %307 }
  0xff   : > { %v305_v42 = vpop.xlane.xlu0 %304 }
 0x100   : > { %v311_v43 = vpop.xlane.xlu1 %310  ;;  %1174 = vrcp.f32 %v305_v42 }
 0x101   : > { %1176 = vrcp.f32 %v302_v40 }
 0x102   : > { %1178 = vrcp.f32 %v311_v43 }
 0x103   : > { %v314_v45 = vpop.xlane.xlu0 %313 }
 0x104   : > { %v317_v44 = vpop.xlane.xlu1 %316 }
 0x105   : > { %1180 = vrcp.f32 %v317_v44 }
 0x106   : > { %1182 = vrcp.f32 %v308_v41 }
 0x107   : > { %1184 = vrcp.f32 %v314_v45  ;;  %v320_v47 = vpop.xlane.xlu0 %319 }
 0x108   : > { %v323_v46 = vpop.xlane.xlu1 %322 }
 0x109   : > { %1186 = vrcp.f32 %v323_v46 }
 0x10a   : > { %1188 = vrcp.f32 %v320_v47 }
 0x10d   : > { %v1175_v48 = vpop.eup %1174 }
 0x10e   : > { %v1177_v49 = vpop.eup %1176 }
 0x10f   : > { %v1179_v53 = vpop.eup %1178 }
 0x112   : > { %v1181_v61 = vpop.eup %1180 }
 0x113   : > { %v1183_v63 = vpop.eup %1182 }
 0x114   : > { %v1185_v3 = vpop.eup %1184 }
 0x116   : > { %v1187_v9 = vpop.eup %1186 }
 0x133   : > { %v1068_v32 = vpop.f32.mrf.mxu0 }
 0x134   : > { %1078 = vmatprep.subr.mxu1 %v1068_v32 }
 0x135   : > { %v428_v33 = vpop.f32.mrf.mxu0  ;;  %1079 = vmatpush3.msra.mxu1 %v1068_v32 }
 0x136   : > { %1080 = vmatprep.subr.mxu1 %v428_v33 }
 0x137   : > { %v1071_v34 = vpop.f32.mrf.mxu0  ;;  %1081 = vmatpush3.msra.mxu1 %v428_v33 }
 0x138   : > { %1083 = vmatmul.mubr.msk.f32.vlgmr.msra.gmra.mxu1 %vm299_vm1, %v1014_v16  ;;  %1085 = vmatprep.subr.mxu1 %v1071_v34 }
 0x139   : > { %v438_v35 = vpop.f32.mrf.mxu0  ;;  %1086 = vmatpush3.msra.mxu1 %v1071_v34  ;;  %1089 = vmatprep.mubr.msk.f32.mxu1 %vm299_vm1, %v1017_v15 }
 0x13a   : > { %1087 = vmatprep.subr.mxu1 %v438_v35 }
 0x13b   : > { %v1074_v36 = vpop.f32.mrf.mxu0  ;;  %1088 = vmatpush3.msra.mxu1 %v438_v35 }
 0x13c   : > { %1090 = vmatmul.mubr.msk.f32.vlgmr.msra.gmra.mxu1 %vm299_vm1, %v1018_v17  ;;  %1092 = vmatprep.subr.mxu1 %v1074_v36  ;;  %v1189_v17 = vpop.eup %1188 }
 0x13d   : > { %v448_v37 = vpop.f32.mrf.mxu0  ;;  %1093 = vmatpush3.msra.mxu1 %v1074_v36  ;;  %1096 = vmatprep.mubr.msk.f32.mxu1 %vm299_vm1, %v1021_v23 }
 0x13e   : > { %1094 = vmatprep.subr.mxu1 %v448_v37 }
 0x13f   : > { %v1077_v38 = vpop.f32.mrf.mxu0  ;;  %1095 = vmatpush3.msra.mxu1 %v448_v37 }
 0x140   : > { %1097 = vmatmul.mubr.msk.f32.vlgmr.msra.gmra.mxu1 %vm299_vm1, %v1022_v24  ;;  %1099 = vmatprep.subr.mxu1 %v1077_v38 }
 0x141   : > { %v458_v39 = vpop.f32.mrf.mxu0  ;;  %1100 = vmatpush3.msra.mxu1 %v1077_v38  ;;  %1103 = vmatprep.mubr.msk.f32.mxu1 %vm299_vm1, %v1025_v28 }
 0x142   : > { %1101 = vmatprep.subr.mxu1 %v458_v39 }
 0x143   : > { %1102 = vmatpush3.msra.mxu1 %v458_v39 }
 0x144   : > { %1104 = vmatmul.mubr.msk.f32.vlgmr.msra.gmra.mxu1 %vm299_vm1, %v1026_v29 }
 0x1f8   : > { %v1084_v51 = vpop.f32.mrf.mxu1 }
 0x1f9   : > { %v792_v52 = vmul.f32 %v1175_v48, %v1084_v51 }
 0x1fa   : > { %v539_v54 = vpop.f32.mrf.mxu1 }
 0x1fb   : > { %v806_v55 = vadd.f32 %v998_v50, %v792_v52  ;;  %v791_v56 = vmul.f32 %v1177_v49, %v539_v54 }
 0x1fc   : > { %v1091_v57 = vpop.f32.mrf.mxu1 }
 0x1fd   : > { %vm814_vm2 = vcmp.gt.f32.partialorder %v806_v55, 0.0  ;;  %v822_v58 = vmul.f32 0.01, %v806_v55  ;;  %v805_v59 = vadd.f32 %v998_v50, %v791_v56  ;;  %v794_v60 = vmul.f32 %v1179_v53, %v1091_v57 }
 0x1fe   : > { %v620_v62 = vpop.f32.mrf.mxu1 }
 0x1ff   : > { %v830_v0 = vsel %vm814_vm2, %v806_v55, %v822_v58  ;;  %vm813_vm3 = vcmp.gt.f32.partialorder %v805_v59, 0.0  ;;  %v821_v1 = vmul.f32 0.01, %v805_v59  ;;  %v808_v2 = vadd.f32 %v998_v50, %v794_v60 }
 0x200   : > { %838 = vst.msk [vmem:[%s1614_s11 + $0x8] sm:$0xff] %vm337_vm0, %v830_v0  ;;  %v793_v4 = vmul.f32 %v1183_v63, %v620_v62  ;;  %v1098_v5 = vpop.f32.mrf.mxu1 }
 0x201   : > { %v829_v6 = vsel %vm813_vm3, %v805_v59, %v821_v1  ;;  %vm816_vm4 = vcmp.gt.f32.partialorder %v808_v2, 0.0  ;;  %v824_v7 = vmul.f32 0.01, %v808_v2  ;;  %v796_v8 = vmul.f32 %v1181_v61, %v1098_v5 }
 0x202   : > { %837 = vst.msk [vmem:[%s1614_s11] sm:$0xff] %vm337_vm0, %v829_v6  ;;  %v807_v10 = vadd.f32 %v998_v50, %v793_v4  ;;  %v701_v11 = vpop.f32.mrf.mxu1 }
 0x203   : > { %v832_v12 = vsel %vm816_vm4, %v808_v2, %v824_v7  ;;  %v810_v13 = vadd.f32 %v998_v50, %v796_v8  ;;  %v795_v14 = vmul.f32 %v1185_v3, %v701_v11 }
 0x204   : > { %840 = vst.msk [vmem:[%s1614_s11 + $0x18] sm:$0xff] %vm337_vm0, %v832_v12  ;;  %vm815_vm5 = vcmp.gt.f32.partialorder %v807_v10, 0.0  ;;  %v823_v15 = vmul.f32 0.01, %v807_v10  ;;  %v1105_v16 = vpop.f32.mrf.mxu1 }
 0x205   : > { %vm818_vm6 = vcmp.gt.f32.partialorder %v810_v13, 0.0  ;;  %v826_v18 = vmul.f32 0.01, %v810_v13  ;;  %v809_v19 = vadd.f32 %v998_v50, %v795_v14  ;;  %v798_v20 = vmul.f32 %v1187_v9, %v1105_v16 }
 0x206   : > { %v831_v21 = vsel %vm815_vm5, %v807_v10, %v823_v15  ;;  %v782_v22 = vpop.f32.mrf.mxu1 }
 0x207   : > { %839 = vst.msk [vmem:[%s1614_s11 + $0x10] sm:$0xff] %vm337_vm0, %v831_v21  ;;  %v834_v23 = vsel %vm818_vm6, %v810_v13, %v826_v18  ;;  %vm817_vm7 = vcmp.gt.f32.partialorder %v809_v19, 0.0  ;;  %v825_v24 = vmul.f32 0.01, %v809_v19  ;;  %v812_v25 = vadd.f32 %v998_v50, %v798_v20 }
 0x208   : > { %842 = vst.msk [vmem:[%s1614_s11 + $0x28] sm:$0xff] %vm337_vm0, %v834_v23  ;;  %v797_v26 = vmul.f32 %v1189_v17, %v782_v22 }
 0x209   : > { %v833_v27 = vsel %vm817_vm7, %v809_v19, %v825_v24  ;;  %vm820_vm8 = vcmp.gt.f32.partialorder %v812_v25, 0.0  ;;  %v828_v28 = vmul.f32 0.01, %v812_v25 }
 0x20a   : > { %841 = vst.msk [vmem:[%s1614_s11 + $0x20] sm:$0xff] %vm337_vm0, %v833_v27  ;;  %v811_v29 = vadd.f32 %v998_v50, %v797_v26 }
 0x20b   : > { %v836_v30 = vsel %vm820_vm8, %v812_v25, %v828_v28 }
 0x20c   : > { %844 = vst.msk [vmem:[%s1614_s11 + $0x38] sm:$0xff] %vm337_vm0, %v836_v30  ;;  %vm819_vm9 = vcmp.gt.f32.partialorder %v811_v29, 0.0  ;;  %v827_v31 = vmul.f32 0.01, %v811_v29 }
 0x20e   : > { %v835_v32 = vsel %vm819_vm9, %v811_v29, %v827_v31 }
 0x20f   : > { %843 = vst.msk [vmem:[%s1614_s11 + $0x30] sm:$0xff] %vm337_vm0, %v835_v32 }
 0x210   : > { %1285 = shalt.err (!%p1282_p10)
}
 0x211   : > { %s1286_s5 = scalar_lea.hbm %s1635_s13, 1024  ;;  %s1290_s23 = scalar_lea.hbm %s1686_s4, 2048 }
 0x212   : > { %p1287_p1 = scmp.ne.s32.totalorder %s1635_s13, %s1286_s5  ;;  %p1291_p7 = scmp.lt.s32.totalorder %s1635_s13, %s1686_s4 }
 0x213   : > { %p1292_p8 = scmp.lt.s32.totalorder %s1290_s23, %s1286_s5 }
 0x214   : > { %p1288_p4 = pnand %p1287_p1, %p1705_p9 }
 0x215   : > { %p1293_p11 = por %p1292_p8, %p1291_p7 }
 0x216   : > { %p1289_p3 = pneg %p1288_p4 }
 0x218   : > { %p1294_p6 = pnand %p1293_p11, %p1289_p3 }
 0x21a   : > { %1297 = shalt.err (!%p1294_p6)
}
 0x21b   : > { %s1354_s21 = smov 128   ;;  %s1355_s8 = smov 8  }
 0x21c   : > { %1114 = dma.vmem_to_hbm [thread:$0]  (%p1705_p9), %s1637_s26, 1024, %s1635_s13, %s846_s19, %s1354_s21, %s1354_s21, %s1355_s8  }
 0x21d PF: > { %s875_s11 = sand.u32 1, %s1332_s15   ;;  %p1706_p12 = scmp.ne.s32.totalorder %s1693_s22, 0 }
 0x21e   : > { %p1707_p13 = scmp.ge.s32.totalorder %s1344_s18, 2  ;;  %s876_s24 = scalar_lea.sflag [#allocation4], %s875_s11 }
 0x220   : > { %p1128_p0 = pnand %p1707_p13, %p1706_p12 }
 0x222   : > { %p1129_p5 = pneg %p1128_p0 }
 0x224   : > { %1327 = dma.done.wait (%p1129_p5), %s876_s24, 1024  }
 0x225   : > { %1329 = vsyncadd (%p1129_p5), %s876_s24, 4294966272  ;;  %p20_p2 = scmp.ge.s32.totalorder %s1435_s27, 4   ;;  %s1708_s15 = smov %s1336_s16 }
 0x226   : > { %s1709_s16 = smov %s1340_s17  ;;  %s1710_s17 = smov %s1455_s9 }
 0x227   : > { %s1711_s18 = smov %s1435_s27  ;;  %22 = sbr.rel (!%p20_p2) target bundleno = 10 (0xa), region = 98 }
 0x22c   :  { %881 = vsyncpa [#allocation3], 1 }
 0x22d   :  { %883 = vsyncpa [#allocation3 + $0x1], 1 }
 0x22e   :  { %884 = vsyncpa [#allocation6], 1 }
 0x22f   :  { %886 = vsyncpa [#allocation6 + $0x1], 1 }
 0x230   :  { %887 = vsyncpa [#allocation4], 1 }
 0x231   :  { %889 = vsyncpa [#allocation4 + $0x1], 1 }

</bundles_post_ra>
